<compile_context>
chip_gen: v7x
topology: tpu7x:2x2x1
jax: 0.10.0
libtpu: 0.0.40
codegen_flags: <defaults>
</compile_context>

<pallas_src>
import functools

import jax
import jax.numpy as jnp
from jax import lax
from jax.experimental import pallas as pl
from jax.experimental.pallas import tpu as pltpu


def _int_pow(x, n):
    """x**n for a static positive integer n via unrolled square-and-multiply (VPU only)."""
    result = None
    base = x
    while n > 0:
        if n & 1:
            result = base if result is None else result * base
        n >>= 1
        if n:
            base = base * base
    return result


def _gem_kernel(p_ref, x_ref, o_ref, acc_ref, *,
                eps, hw, hw_tile, need_mask, p_int, p_static, compute_dtype):
    """One (ROW_TILE, HW_TILE) tile of GeM pooling.

    p_ref:   SMEM f32[1]                      -- GeM exponent (nn.Parameter p)
    x_ref:   VMEM x.dtype[ROW_TILE, HW_TILE]  -- input tile (native dtype)
    o_ref:   VMEM x.dtype[1, 1, ROW_TILE]     -- lane-dense per-row result
    acc_ref: VMEM f32[ROW_TILE, 1]            -- running per-row sum of x^p
    """
    h = pl.program_id(1)
    last = pl.num_programs(1) - 1

    @pl.when(h == 0)
    def _init():
        acc_ref[...] = jnp.zeros_like(acc_ref)

    x = x_ref[...]
    if p_int is not None:
        # Fast path for static integer p (PyTorch default p=3): pure VPU mults,
        # avoids the exp/log EUP path that would otherwise bind.
        xc = jnp.maximum(x.astype(jnp.float32), jnp.float32(eps))
        xp = _int_pow(xc, p_int)
    else:
        # Generic path: pow(x, p) == exp(p * log(x)) since x >= eps > 0 after the
        # clamp (skips lax.pow sign/integer special-casing).  For bf16 inputs the
        # transcendentals run in bf16 (native EUP on v6e/v7x).
        cdt = compute_dtype
        xc = jnp.maximum(x.astype(cdt), jnp.asarray(eps, cdt))
        logx = jnp.log(xc)
        if p_static is not None:
            scaled = logx * jnp.asarray(p_static, cdt)
        else:
            scaled = (logx.astype(jnp.float32) * p_ref[0]).astype(cdt)
        xp = jnp.exp(scaled)

    def _accumulate(mask_tail):
        xpl = xp
        if mask_tail:
            col = h * hw_tile + lax.broadcasted_iota(jnp.int32, xp.shape, 1)
            xpl = jnp.where(col < hw, xp, jnp.zeros_like(xp))
        # Row-major (ROW_TILE, 1) accumulate: no per-step sublane->lane relayout.
        acc_ref[...] += jnp.sum(xpl.astype(jnp.float32), axis=-1, keepdims=True)

    if need_mask:
        # Pay the ragged-H*W mask only on the final spatial step.
        @pl.when(h < last)
        def _steady():
            _accumulate(False)

        @pl.when(h == last)
        def _tail():
            _accumulate(True)
    else:
        _accumulate(False)

    @pl.when(h == last)
    def _finalize():
        mean = acc_ref[...] * jnp.float32(1.0 / hw)            # (ROW_TILE, 1), f32
        inv_p = (jnp.float32(1.0 / p_static) if p_static is not None
                 else 1.0 / p_ref[0])
        res = jnp.power(mean, inv_p)                           # per-row, cheap
        # Single relayout to the lane-dense output layout, once per row tile.
        o_ref[...] = res.reshape(o_ref.shape).astype(o_ref.dtype)


def _round_up(a, b):
    return (a + b - 1) // b * b


def _choose_tiles(bc, hw, itemsize, budget, row_mult, row_cap=4096):
    """Pick (row_tile, hw_tile) so one x block stays within `budget` bytes,
    respecting TPU block-shape rules (sublane multiple of 8 / dtype-native
    multiple, or full dim; lane multiple of 128 or full dim)."""
    if bc < row_mult:
        row_tile = bc                                  # full-dim row block
        if bc * hw * itemsize <= budget:
            return row_tile, hw
        hw_tile = max(128, (budget // (bc * itemsize)) // 128 * 128)
        return row_tile, hw_tile
    if row_mult * hw * itemsize > budget:
        # Very large spatial extent: split H*W, keep native-tile row blocks.
        hw_tile = max(128, (budget // (row_mult * itemsize)) // 128 * 128)
        return row_mult, hw_tile
    # Common case: full H*W per block, as many rows as fit.
    rows_fit = (budget // (hw * itemsize)) // row_mult * row_mult
    row_tile = min(rows_fit, _round_up(bc, row_mult), row_cap)
    if bc >= 2 * row_mult:
        # Keep >= 2 row blocks so the "parallel" row axis has work for both
        # TensorCores on v7x (near-free extra grid step on 1-TC chips).
        row_tile = min(row_tile, _round_up(-(-bc // 2), row_mult))
    return max(row_tile, row_mult), hw


def _auto_budgets():
    """Generation-aware (block_budget_bytes, vmem_limit_bytes)."""
    try:
        cap = pltpu.get_tpu_info().vmem_capacity_bytes
    except Exception:
        cap = 64 << 20
    if cap >= (128 << 20):        # v5e / v6e: 128 MiB VMEM
        return 16 << 20, 64 << 20
    return 12 << 20, 40 << 20     # v7x-class: 64 MiB per TC


def _static_float(p):
    """Trace-time value of p if it is concrete, else None."""
    try:
        return float(jax.device_get(jnp.asarray(p)).reshape(-1)[0])
    except Exception:
        return None


def gem_pallas(x, p, eps=1e-6, *, _block_budget=None):
    """GeM pooling. x: (B, C, H, W); p: scalar/(1,) float. Returns (B, C, 1, 1) in x.dtype."""
    B, C, H, W = x.shape
    BC, HW = B * C, H * W

    xf = x.reshape(BC, HW)                              # free view, native dtype
    p_arr = jnp.asarray(p, dtype=jnp.float32).reshape((1,))

    p_static = _static_float(p)
    p_int = None
    if p_static is not None:
        r = round(p_static)
        if abs(p_static - r) < 1e-9 and 1 <= r <= 16:
            p_int = int(r)

    compute_dtype = (jnp.bfloat16
                     if (p_int is None and x.dtype == jnp.bfloat16)
                     else jnp.float32)

    auto_budget, vmem_limit = _auto_budgets()
    budget = auto_budget if _block_budget is None else _block_budget

    row_mult = max(8, 32 // x.dtype.itemsize)           # f32:8, bf16:16, int8/fp8:32
    row_tile, hw_tile = _choose_tiles(BC, HW, x.dtype.itemsize, budget, row_mult)
    n_row = -(-BC // row_tile)
    n_hw = -(-HW // hw_tile)
    need_mask = (HW % hw_tile) != 0

    kernel = functools.partial(
        _gem_kernel, eps=float(eps), hw=HW, hw_tile=hw_tile, need_mask=need_mask,
        p_int=p_int, p_static=p_static, compute_dtype=compute_dtype)

    out = pl.pallas_call(
        kernel,
        out_shape=jax.ShapeDtypeStruct((n_row, 1, row_tile), x.dtype),
        grid_spec=pltpu.PrefetchScalarGridSpec(
            num_scalar_prefetch=0,
            grid=(n_row, n_hw),
            in_specs=[
                pl.BlockSpec(memory_space=pltpu.MemorySpace.SMEM),        # p
                pl.BlockSpec((row_tile, hw_tile), lambda r, h: (r, h)),   # x tile
            ],
            out_specs=pl.BlockSpec((1, 1, row_tile), lambda r, h: (r, 0, 0)),
            scratch_shapes=[pltpu.VMEM((row_tile, 1), jnp.float32)],
        ),
        compiler_params=pltpu.CompilerParams(
            dimension_semantics=("parallel", "arbitrary"),
            vmem_limit_bytes=int(vmem_limit),
        ),
    )(p_arr, xf)

    return out.reshape(n_row * row_tile)[:BC].reshape(B, C, 1, 1)


def gem_reference(x, p, eps=1e-6):
    """Pure-JAX reference matching the PyTorch forward."""
    xc = jnp.maximum(x.astype(jnp.float32), eps)
    xp = jnp.power(xc, jnp.asarray(p, jnp.float32).reshape(()))
    mean = jnp.mean(xp, axis=(-2, -1), keepdims=True)
    return jnp.power(mean, 1.0 / jnp.asarray(p, jnp.float32).reshape(()))


if __name__ == "__main__":
    key = jax.random.PRNGKey(0)
    eps = 1e-6
    # Deterministic parameter, mirroring nn.Parameter(torch.ones(1) * 3)
    p_param = jnp.ones((1,), dtype=jnp.float32) * 3.0

    B, C, H, W = 2, 4, 16, 16
    x = jax.random.normal(key, (B, C, H, W), dtype=jnp.float32)

    # 1) Default config: p=3 -> static integer-power (VPU) fast path.
    out = jax.block_until_ready(gem_pallas(x, p_param, eps=eps))
    ref = gem_reference(x, p_param, eps=eps)
    assert out.shape == (B, C, 1, 1), out.shape
    assert jnp.allclose(out, ref, atol=1e-5, rtol=1e-5), (
        f"max err {jnp.max(jnp.abs(out - ref))}")

    # 2) Native bf16 input: halved HBM traffic; fast path keeps it memory-bound.
    x_bf16 = x.astype(jnp.bfloat16)
    out_bf16 = jax.block_until_ready(gem_pallas(x_bf16, p_param, eps=eps))
    ref_bf16 = gem_reference(x_bf16, p_param, eps=eps)
    assert out_bf16.dtype == jnp.bfloat16
    assert jnp.allclose(out_bf16.astype(jnp.float32), ref_bf16, atol=2e-2, rtol=2e-2)

    # 3) Ragged rows + forced H*W split: accumulator + last-step tail mask path.
    x2 = jax.random.normal(jax.random.PRNGKey(1), (2, 5, 16, 19), dtype=jnp.float32)
    out2 = jax.block_until_ready(gem_pallas(x2, p_param, eps=eps, _block_budget=8192))
    ref2 = gem_reference(x2, p_param, eps=eps)
    assert out2.shape == (2, 5, 1, 1), out2.shape
    assert jnp.allclose(out2, ref2, atol=1e-5, rtol=1e-5), (
        f"max err {jnp.max(jnp.abs(out2 - ref2))}")

    # 4) Non-integer p: generic exp(p*log(x)) path in f32.
    p_frac = jnp.ones((1,), dtype=jnp.float32) * 2.5
    out3 = jax.block_until_ready(gem_pallas(x, p_frac, eps=eps))
    ref3 = gem_reference(x, p_frac, eps=eps)
    assert jnp.allclose(out3, ref3, atol=1e-4, rtol=1e-4), (
        f"max err {jnp.max(jnp.abs(out3 - ref3))}")

    # 5) Non-integer p with bf16 input: bf16 transcendental path, f32 accumulate.
    out4 = jax.block_until_ready(gem_pallas(x_bf16, p_frac, eps=eps))
    ref4 = gem_reference(x_bf16, p_frac, eps=eps)
    assert jnp.allclose(out4.astype(jnp.float32), ref4, atol=2e-2, rtol=2e-2), (
        f"max err {jnp.max(jnp.abs(out4.astype(jnp.float32) - ref4))}")

    print("KERNEL_OK")
</pallas_src>

<mosaic_0001>
module attributes {stable_mosaic.version = 11 : i64} {
  func.func @_gem_kernel(%arg0: i32, %arg1: i32, %arg2: memref<1xf32, #tpu.memory_space<smem>>, %arg3: memref<8x256xf32, #tpu.memory_space<vmem>>, %arg4: memref<1x1x8xf32, #tpu.memory_space<vmem>>, %arg5: memref<8x1xf32, #tpu.memory_space<vmem>>) attributes {dimension_semantics = [#tpu.dimension_semantics<parallel>, #tpu.dimension_semantics<arbitrary>], iteration_bounds = array<i64: 1, 1>, scalar_prefetch = 0 : i64, scratch_operands = 1 : i64, tpu.core_type = #tpu.core_type<tc>, window_params = [{transform_indices = @transform_0, window_bounds = array<i64: 1>}, {transform_indices = @transform_1, window_bounds = array<i64: 8, 256>}, {transform_indices = @transform_2, window_bounds = array<i64: 1, 1, 8>}]} {
    %c0_i32 = arith.constant 0 : i32
    %0 = arith.cmpi eq, %arg1, %c0_i32 : i32
    %1 = arith.extui %0 : i1 to i32
    %c0_i32_0 = arith.constant 0 : i32
    %2 = arith.cmpi ne, %1, %c0_i32_0 : i32
    scf.if %2 {
      %cst_9 = arith.constant 0.000000e+00 : f32
      %16 = vector.broadcast %cst_9 : f32 to vector<8x1xf32>
      %c0_10 = arith.constant 0 : index
      %c0_11 = arith.constant 0 : index
      %17 = vector.load %arg5[%c0_10, %c0_11] : memref<8x1xf32, #tpu.memory_space<vmem>>, vector<8x1xf32>
      tpu.vector_store %arg5[%c0_10, %c0_11], %16 {strides = array<i32>} : memref<8x1xf32, #tpu.memory_space<vmem>>, vector<8x1xf32>,
    } else {
    }
    %c0 = arith.constant 0 : index
    %c0_1 = arith.constant 0 : index
    %3 = vector.load %arg3[%c0, %c0_1] : memref<8x256xf32, #tpu.memory_space<vmem>>, vector<8x256xf32>
    %cst = arith.constant 9.99999997E-7 : f32
    %4 = vector.broadcast %cst : f32 to vector<8x256xf32>
    %5 = arith.maximumf %3, %4 : vector<8x256xf32>
    %6 = arith.mulf %5, %5 : vector<8x256xf32>
    %7 = arith.mulf %5, %6 : vector<8x256xf32>
    %c0_2 = arith.constant 0 : index
    %c0_3 = arith.constant 0 : index
    %8 = vector.load %arg5[%c0_2, %c0_3] : memref<8x1xf32, #tpu.memory_space<vmem>>, vector<8x1xf32>
    %cst_4 = arith.constant dense<0.000000e+00> : vector<8xf32>
    %9 = vector.multi_reduction <add>, %7, %cst_4 [1] : vector<8x256xf32> to vector<8xf32>
    %10 = vector.shape_cast %9 : vector<8xf32> to vector<8x1xf32>
    %11 = arith.addf %8, %10 : vector<8x1xf32>
    %c0_5 = arith.constant 0 : index
    %c0_6 = arith.constant 0 : index
    %12 = vector.load %arg5[%c0_5, %c0_6] : memref<8x1xf32, #tpu.memory_space<vmem>>, vector<8x1xf32>
    tpu.vector_store %arg5[%c0_5, %c0_6], %11 {strides = array<i32>} : memref<8x1xf32, #tpu.memory_space<vmem>>, vector<8x1xf32>,
    %c0_i32_7 = arith.constant 0 : i32
    %13 = arith.cmpi eq, %arg1, %c0_i32_7 : i32
    %14 = arith.extui %13 : i1 to i32
    %c0_i32_8 = arith.constant 0 : i32
    %15 = arith.cmpi ne, %14, %c0_i32_8 : i32
    scf.if %15 {
      %c0_9 = arith.constant 0 : index
      %c0_10 = arith.constant 0 : index
      %16 = vector.load %arg5[%c0_9, %c0_10] : memref<8x1xf32, #tpu.memory_space<vmem>>, vector<8x1xf32>
      %cst_11 = arith.constant 3.906250e-03 : f32
      %17 = vector.broadcast %cst_11 : f32 to vector<8x1xf32>
      %18 = arith.mulf %16, %17 : vector<8x1xf32>
      %cst_12 = arith.constant 0.333333343 : f32
      %19 = vector.broadcast %cst_12 : f32 to vector<8x1xf32>
      %20 = math.powf %18, %19 : vector<8x1xf32>
      %21 = vector.shape_cast %20 : vector<8x1xf32> to vector<1x1x8xf32>
      %c0_13 = arith.constant 0 : index
      %c0_14 = arith.constant 0 : index
      %c0_15 = arith.constant 0 : index
      %22 = vector.load %arg4[%c0_13, %c0_14, %c0_15] : memref<1x1x8xf32, #tpu.memory_space<vmem>>, vector<1x1x8xf32>
      tpu.vector_store %arg4[%c0_13, %c0_14, %c0_15], %21 {strides = array<i32>} : memref<1x1x8xf32, #tpu.memory_space<vmem>>, vector<1x1x8xf32>,
    } else {
    }
    return
  }
  func.func @transform_0(%arg0: i32, %arg1: i32) -> i32 {
    %c0_i32 = arith.constant 0 : i32
    %c0_i32_0 = arith.constant 0 : i32
    return %c0_i32 : i32
  }
  func.func @transform_1(%arg0: i32, %arg1: i32) -> (i32, i32) {
    %c0_i32 = arith.constant 0 : i32
    return %arg0, %arg1 : i32, i32
  }
  func.func @transform_2(%arg0: i32, %arg1: i32) -> (i32, i32, i32) {
    %c0_i32 = arith.constant 0 : i32
    %c0_i32_0 = arith.constant 0 : i32
    %c0_i32_1 = arith.constant 0 : i32
    return %arg0, %c0_i32, %c0_i32_0 : i32, i32, i32
  }
}

</mosaic_0001>

<bundles_post_ra>
// kernel: tpu_custom_call.1
= control target key start
LH: loop header
LB: loop body
LE: loop exit
PB: predicated region body
PF: predicated region fallthrough
CT: control target
= control target key end

     0   :  { %8 = vsyncpa [#allocation5], 0  ;;  %s200_s0 = inlined_call_operand.<no memory space> [shape: f32[1], index: 0, kind: input, shape index: {}]   ;;  %s201_s1 = inlined_call_operand.hbm [shape: f32[8,256], index: 1, kind: input, shape index: {}]   ;;  %s202_s2 = inlined_call_operand.hbm [shape: f32[1,1,8], index: 2, kind: output, shape index: {}]  }
   0x1   :  { %9 = vsyncpa [#allocation6], 0  ;;  %s155_s9 = smov [#allocation4]   ;;  %s107_s13 = scalar_lea.hbm %s201_s1, 256 }
   0x2   :  { %s18_s10 = sshll.u32 %s155_s9, 4  ;;  %p108_p0 = scmp.ne.s32.totalorder %s201_s1, %s107_s13  ;;  %s19_s10 = int_to_ptr.vmem [resolvable:$true] %s18_s10 }
   0x3   :  { %p111_p1 = scmp.lt.u32.totalorder %s107_s13, %s201_s1 }
   0x5   :  { %p113_p2 = pnand %p111_p1, %p108_p0 }
   0x7   :  { %116 = shalt.err (!%p113_p2)
}
   0x8   :  { %s117_s17 = scalar_lea.vmem %s19_s10, 256  ;;  %p122_p4 = scmp.lt.s32.totalorder %s19_s10, %s19_s10 }
   0x9   :  { %p118_p3 = scmp.ne.s32.totalorder %s19_s10, %s117_s17  ;;  %p123_p5 = scmp.lt.s32.totalorder %s117_s17, %s117_s17 }
   0xb   :  { %p124_p6 = por %p123_p5, %p122_p4 }
   0xd   :  { %p125_p7 = pnand %p124_p6, %p118_p3 }
   0xf   :  { %128 = shalt.err (!%p125_p7)
}
  0x10   :  { %21 = dma.hbm_to_vmem [thread:$0]  %s201_s1, 256, %s19_s10, [#allocation5]  }
  0x11   :  { %151 = dma.done.wait [#allocation5], 256  }
  0x12   :  { %152 = vsyncadd [#allocation5], 4294967040  ;;  %vm29_vm0 = vcmask 7168   ;;  %v156_v0 = vmov 0.0   ;;  %v31_v1 = vld [vmem:[#allocation4] sm:$0xff]  ;;  %v32_v2 = vld [vmem:[#allocation4 + $0x8] sm:$0xff]  ;;  %v56_v27 = vlaneseq }
  0x13   :  { %30 = vst.msk [vmem:[#allocation2] sm:$0xff] %vm29_vm0, %v156_v0  ;;  %v33_v3 = vmax.f32 %v31_v1, 1e-06  ;;  %v34_v4 = vmax.f32 %v32_v2, 1e-06  ;;  %v157_v10 = vmov 0  }
  0x14   :  { %102 = vset.pattern.permute.xlu0 %v157_v10  ;;  %v57_v28 = vand.u32 127, %v56_v27  ;;  %v59_v29 = vshrl.u32 %v56_v27, 7  ;;  %s158_s1 = smov [#allocation7]   ;;  %vm63_vm6 = vcmask 57344  }
  0x15   :  { %v35_v5 = vmul.f32 %v33_v3, %v33_v3  ;;  %v36_v6 = vmul.f32 %v34_v4, %v34_v4  ;;  %s71_s20 = sshll.u32 %s158_s1, 4  ;;  %s72_s20 = int_to_ptr.vmem [resolvable:$true] %s71_s20 }
  0x16   :  { %v60_v30 = vsub.s32 %v57_v28, %v59_v29  ;;  %s129_s21 = scalar_lea.vmem %s72_s20, 16  ;;  %s133_s22 = scalar_lea.vmem %s72_s20, 32 }
  0x17   :  { %v37_v7 = vmul.f32 %v35_v5, %v33_v3  ;;  %v38_v8 = vmul.f32 %v36_v6, %v34_v4  ;;  %p130_p8 = scmp.ne.s32.totalorder %s72_s20, %s129_s21  ;;  %p134_p9 = scmp.lt.s32.totalorder %s72_s20, %s72_s20 }
  0x18   :  { %p135_p10 = scmp.lt.s32.totalorder %s133_s22, %s129_s21 }
  0x19   :  { %v40_v9 = vadd.f32 %v38_v8, %v37_v7 }
  0x1a   :  { %v39_v11 = vld [vmem:[#allocation2] sm:$0xff]  ;;  %p136_p11 = por %p135_p10, %p134_p9 }
  0x1b   :  { %41 = vadd.xlane.f32.xlu0 %v40_v9 }
  0x1c   :  { %p137_p12 = pnand %p136_p11, %p130_p8 }
  0xa8   :  { %v42_v12 = vpop.xlane.xlu0 %41 }
  0xa9   :  { %v43_v13 = vadd.f32 %v42_v12, %v39_v11 }
  0xab   :  { %45 = vst.msk [vmem:[#allocation2] sm:$0xff] %vm29_vm0, %v43_v13 }
  0xb2   :  { %v49_v14 = vld [vmem:[#allocation2] sm:$0xff] }
  0xb3   :  { %v50_v15 = vmul.f32 0.00390625, %v49_v14 }
  0xb5   :  { %v82_v16 = vand.u32 2147483647, %v50_v15  ;;  %v86_v19 = vand.u32 2147483648, %v50_v15  ;;  %vm81_vm3 = vcmp.lt.f32.partialorder %v50_v15, 0.0  ;;  %vm80_vm4 = vcmp.eq.f32.partialorder %v50_v15, 0.0 }
  0xb7   :  { %103 = vlog2.f32 %v82_v16  ;;  %vm90_vm1 = vweird.f32 %v82_v16  ;;  %vm92_vm2 = vcmp.eq.f32.partialorder %v82_v16, 0.0  ;;  %vm83_vm5 = vcmp.eq.f32.partialorder %v82_v16, inf }
  0xc1   :  { %v104_v17 = vpop.eup %103 }
  0xc2   :  { %v87_v18 = vmul.f32 0.33333334, %v104_v17 }
  0xc4   :  { %105 = vpow2.f32 %v87_v18 }
  0xce   :  { %v106_v20 = vpop.eup %105 }
  0xcf   :  { %v89_v21 = vor.u32 %v106_v20, %v86_v19 }
  0xd1   :  { %v91_v22 = vsel %vm90_vm1, %v50_v15, %v89_v21 }
  0xd2   :  { %v94_v23 = vsel %vm92_vm2, %v86_v19, %v91_v22 }
  0xd3   :  { %v95_v24 = vsel %vm81_vm3, nan, %v94_v23 }
  0xd4   :  { %v96_v25 = vsel %vm80_vm4, 0.0, %v95_v24 }
  0xd5   :  { %v97_v26 = vsel %vm83_vm5, inf, %v96_v25 }
  0xd6   :  { %54 = vperm.xlu0 %102, %v97_v26  }
 0x155   :  { %v55_v31 = vpop.permute.xlu0 %54 }
 0x156   :  { %v61_v32 = vrot.slane %v55_v31, %v60_v30 }
 0x158   :  { %64 = vst.msk [vmem:[#allocation7] sm:$0x1] %vm63_vm6, %v61_v32 }
 0x159   :  { %140 = shalt.err (!%p137_p12)
}
 0x15a   :  { %s141_s25 = scalar_lea.hbm %s202_s2, 16 }
 0x15b   :  { %p142_p13 = scmp.ne.s32.totalorder %s202_s2, %s141_s25  ;;  %p145_p0 = scmp.lt.u32.totalorder %s141_s25, %s202_s2 }
 0x15d   :  { %p147_p1 = pnand %p145_p0, %p142_p13 }
 0x15f   :  { %150 = shalt.err (!%p147_p1)
}
 0x160   :  { %74 = dma.vmem_to_hbm [thread:$0]  %s72_s20, 16, %s202_s2, [#allocation6]  }
 0x161   :  { %153 = dma.done.wait [#allocation6], 16  }
 0x162   :  { %154 = vsyncadd [#allocation6], 4294967280 }
 0x163   :  { %78 = vsyncpa [#allocation5], 1 }
 0x164   :  { %79 = vsyncpa [#allocation6], 1 }

</bundles_post_ra>
